<compile_context>
chip_gen: v6e
topology: v6e:2x2x1
jax: 0.10.0
libtpu: 0.0.40
codegen_flags: <defaults>
</compile_context>

<pallas_src>
import numpy as np
import jax
import jax.numpy as jnp
from jax.experimental import pallas as pl
from jax.experimental.pallas import tpu as pltpu


_LUMA_WEIGHTS = (0.299, 0.587, 0.114)
_TARGET_BLOCK_BYTES = 1 << 20  # ~1 MiB of input payload per block


def _make_gray_kernel(w0, w1, w2, compute_dtype):
    def _gray_kernel(x_ref, o_ref):
        # x_ref / o_ref: (bn, 3, tp) blocks; last dim is the flattened, lane-dense
        # pixel axis.  Read each channel straight from the Ref (views, not a
        # materialized 3-channel tile).
        r = x_ref[:, 0, :]
        g = x_ref[:, 1, :]
        b = x_ref[:, 2, :]
        if r.dtype != compute_dtype:
            r = r.astype(compute_dtype)
            g = g.astype(compute_dtype)
            b = b.astype(compute_dtype)
        l = (w0 * r + w1 * g + w2 * b).astype(o_ref.dtype)
        # cat([l, l, l], dim=1): same luminance written to all three channels.
        o_ref[:, 0, :] = l
        o_ref[:, 1, :] = l
        o_ref[:, 2, :] = l

    return _gray_kernel


def _choose_tiles(n, p, itemsize):
    """Pick (batch_tile, pixel_tile) targeting ~1 MiB blocks, lane-dense last dim."""
    if p >= 128:
        # Largest multiple of 128 that keeps a 3-channel block under the target.
        cap = max(128, (_TARGET_BLOCK_BYTES // (3 * itemsize)) // 128 * 128)
        tp = p if p <= cap else cap  # multiple of 128 when tiling; full dim otherwise
    else:
        tp = p  # tiny image: full (possibly masked) last dim is unavoidable
    if tp == p:
        # Whole image fits -> batch several images per grid step.
        bn = max(1, min(n, _TARGET_BLOCK_BYTES // max(1, 3 * p * itemsize)))
        if n >= 2:
            # Keep >=2 independent grid steps so both v7x TensorCores get work.
            bn = min(bn, -(-n // 2))
    else:
        bn = 1
    return bn, tp


def random_color_gray_layer(x, weight=_LUMA_WEIGHTS):
    """Pallas TPU equivalent of RandomColorGrayLayer.forward.

    x: (N, 3, H, W).  weight: compile-time-constant luminance coefficients,
    any shape holding exactly 3 values (e.g. the module's (1, 3, 1, 1) buffer).
    Returns (N, 3, H, W): luminance replicated across the 3 output channels.
    """
    n, c, h, w = x.shape
    assert c == 3, "RandomColorGrayLayer expects 3 input channels (RGB)"

    w_np = np.asarray(weight, dtype=np.float64).reshape(-1)
    assert w_np.shape == (3,), "weight must have exactly 3 elements"
    w0, w1, w2 = float(w_np[0]), float(w_np[1]), float(w_np[2])

    # dtype policy (see header): bf16 native, other floats in f32, ints -> f32.
    if x.dtype == jnp.bfloat16:
        compute_dtype = jnp.bfloat16
        out_dtype = jnp.bfloat16
    elif jnp.issubdtype(x.dtype, jnp.floating):
        compute_dtype = jnp.float32
        out_dtype = x.dtype
    else:
        compute_dtype = jnp.float32
        out_dtype = jnp.float32

    # Flatten H*W (free for contiguous NCHW) so the lane axis is big & dense.
    p = h * w
    x2 = x.reshape(n, 3, p)

    bn, tp = _choose_tiles(n, p, x.dtype.itemsize)
    grid = (pl.cdiv(n, bn), pl.cdiv(p, tp))

    kernel = _make_gray_kernel(w0, w1, w2, compute_dtype)

    out2 = pl.pallas_call(
        kernel,
        out_shape=jax.ShapeDtypeStruct((n, 3, p), out_dtype),
        grid=grid,
        in_specs=[pl.BlockSpec((bn, 3, tp), lambda i, j: (i, 0, j))],
        out_specs=pl.BlockSpec((bn, 3, tp), lambda i, j: (i, 0, j)),
        compiler_params=pltpu.CompilerParams(
            dimension_semantics=("parallel", "parallel"),
            vmem_limit_bytes=32 * 1024 * 1024,
        ),
    )(x2)

    # TODO(synk): callers that can consume a single (N,1,H,W) luminance plane, or
    # fuse this with the neighboring augmentation / random-apply mask in the same
    # pallas_call, would cut HBM traffic ~2-3x; the 3-channel output is kept here
    # to preserve the module's forward semantics.
    return out2.reshape(n, 3, h, w)


if __name__ == "__main__":
    # Fixed luminance coefficients, same shape as the module's registered buffer.
    weight = jnp.array([0.299, 0.587, 0.114], dtype=jnp.float32).reshape(1, 3, 1, 1)

    # Small deterministic NCHW input consistent with the module (C must be 3).
    key = jax.random.PRNGKey(0)
    x = jax.random.normal(key, (2, 3, 16, 16), dtype=jnp.float32)

    out = random_color_gray_layer(x, weight)
    out = jax.block_until_ready(out)

    # Reference: plain-JAX equivalent of F.conv2d(x, weight) followed by cat.
    l_ref = jnp.einsum("nchw,c->nhw", x, weight.reshape(3))[:, None, :, :]
    ref = jnp.concatenate([l_ref, l_ref, l_ref], axis=1)

    assert out.shape == (2, 3, 16, 16)
    assert out.dtype == x.dtype
    assert jnp.allclose(out, ref, atol=1e-5, rtol=1e-5), "mismatch vs reference"

    print("KERNEL_OK")
</pallas_src>

<mosaic_0001>
module attributes {stable_mosaic.version = 11 : i64} {
  func.func @_gray_kernel(%arg0: i32, %arg1: i32, %arg2: memref<1x3x256xf32, #tpu.memory_space<vmem>>, %arg3: memref<1x3x256xf32, #tpu.memory_space<vmem>>) attributes {dimension_semantics = [#tpu.dimension_semantics<parallel>, #tpu.dimension_semantics<parallel>], iteration_bounds = array<i64: 2, 1>, scalar_prefetch = 0 : i64, scratch_operands = 0 : i64, tpu.core_type = #tpu.core_type<tc>, window_params = [{transform_indices = @transform_0, window_bounds = array<i64: 1, 3, 256>}, {transform_indices = @transform_1, window_bounds = array<i64: 1, 3, 256>}]} {
    %c0 = arith.constant 0 : index
    %c0_0 = arith.constant 0 : index
    %c0_1 = arith.constant 0 : index
    %0 = vector.load %arg2[%c0, %c0_0, %c0_1] : memref<1x3x256xf32, #tpu.memory_space<vmem>>, vector<1x1x256xf32>
    %1 = vector.shape_cast %0 : vector<1x1x256xf32> to vector<1x256xf32>
    %c0_2 = arith.constant 0 : index
    %c1 = arith.constant 1 : index
    %c0_3 = arith.constant 0 : index
    %2 = vector.load %arg2[%c0_2, %c1, %c0_3] : memref<1x3x256xf32, #tpu.memory_space<vmem>>, vector<1x1x256xf32>
    %3 = vector.shape_cast %2 : vector<1x1x256xf32> to vector<1x256xf32>
    %c0_4 = arith.constant 0 : index
    %c2 = arith.constant 2 : index
    %c0_5 = arith.constant 0 : index
    %4 = vector.load %arg2[%c0_4, %c2, %c0_5] : memref<1x3x256xf32, #tpu.memory_space<vmem>>, vector<1x1x256xf32>
    %5 = vector.shape_cast %4 : vector<1x1x256xf32> to vector<1x256xf32>
    %cst = arith.constant 2.990000e-01 : f32
    %6 = vector.broadcast %cst : f32 to vector<1x256xf32>
    %7 = arith.mulf %6, %1 : vector<1x256xf32>
    %cst_6 = arith.constant 5.870000e-01 : f32
    %8 = vector.broadcast %cst_6 : f32 to vector<1x256xf32>
    %9 = arith.mulf %8, %3 : vector<1x256xf32>
    %10 = arith.addf %7, %9 : vector<1x256xf32>
    %cst_7 = arith.constant 1.140000e-01 : f32
    %11 = vector.broadcast %cst_7 : f32 to vector<1x256xf32>
    %12 = arith.mulf %11, %5 : vector<1x256xf32>
    %13 = arith.addf %10, %12 : vector<1x256xf32>
    %c0_8 = arith.constant 0 : index
    %c0_9 = arith.constant 0 : index
    %c0_10 = arith.constant 0 : index
    %14 = vector.load %arg3[%c0_8, %c0_9, %c0_10] : memref<1x3x256xf32, #tpu.memory_space<vmem>>, vector<1x1x256xf32>
    %15 = vector.shape_cast %14 : vector<1x1x256xf32> to vector<1x256xf32>
    %16 = vector.shape_cast %13 : vector<1x256xf32> to vector<1x1x256xf32>
    tpu.vector_store %arg3[%c0_8, %c0_9, %c0_10], %16 {strides = array<i32>} : memref<1x3x256xf32, #tpu.memory_space<vmem>>, vector<1x1x256xf32>,
    %c0_11 = arith.constant 0 : index
    %c1_12 = arith.constant 1 : index
    %c0_13 = arith.constant 0 : index
    %17 = vector.load %arg3[%c0_11, %c1_12, %c0_13] : memref<1x3x256xf32, #tpu.memory_space<vmem>>, vector<1x1x256xf32>
    %18 = vector.shape_cast %17 : vector<1x1x256xf32> to vector<1x256xf32>
    %19 = vector.shape_cast %13 : vector<1x256xf32> to vector<1x1x256xf32>
    tpu.vector_store %arg3[%c0_11, %c1_12, %c0_13], %19 {strides = array<i32>} : memref<1x3x256xf32, #tpu.memory_space<vmem>>, vector<1x1x256xf32>,
    %c0_14 = arith.constant 0 : index
    %c2_15 = arith.constant 2 : index
    %c0_16 = arith.constant 0 : index
    %20 = vector.load %arg3[%c0_14, %c2_15, %c0_16] : memref<1x3x256xf32, #tpu.memory_space<vmem>>, vector<1x1x256xf32>
    %21 = vector.shape_cast %20 : vector<1x1x256xf32> to vector<1x256xf32>
    %22 = vector.shape_cast %13 : vector<1x256xf32> to vector<1x1x256xf32>
    tpu.vector_store %arg3[%c0_14, %c2_15, %c0_16], %22 {strides = array<i32>} : memref<1x3x256xf32, #tpu.memory_space<vmem>>, vector<1x1x256xf32>,
    return
  }
  func.func @transform_0(%arg0: i32, %arg1: i32) -> (i32, i32, i32) {
    %c0_i32 = arith.constant 0 : i32
    %c0_i32_0 = arith.constant 0 : i32
    return %arg0, %c0_i32, %arg1 : i32, i32, i32
  }
  func.func @transform_1(%arg0: i32, %arg1: i32) -> (i32, i32, i32) {
    %c0_i32 = arith.constant 0 : i32
    %c0_i32_0 = arith.constant 0 : i32
    return %arg0, %c0_i32, %arg1 : i32, i32, i32
  }
}

</mosaic_0001>

<bundles_post_ra>
// kernel: tpu_custom_call.1
= control target key start
LH: loop header
LB: loop body
LE: loop exit
PB: predicated region body
PF: predicated region fallthrough
CT: control target
= control target key end

     0   :  { %s337_s6 = smov 0   ;;  %s339_s7 = smov 0   ;;  %s367_s0 = inlined_call_operand.vmem [shape: f32[2,3,256], index: 0, kind: input, shape index: {}]   ;;  %s368_s1 = inlined_call_operand.vmem [shape: f32[2,3,256], index: 1, kind: output, shape index: {}]  }
   0x1   :  { %s341_s8 = smov 0  }
   0x2 LB: > { %s23_s9 = sadd.s32 1, %s321_s7  ;;  %p266_p0 = scmp.ge.s32.totalorder %s325_s8, 1  ;;  %s325_s8 = sphi %s341_s8, %s11_s8   ;;  %s321_s7 = sphi %s339_s7, %s370_s7   ;;  %s317_s6 = sphi %s337_s6, %s369_s6  }
   0x3   : > { %p25_p1 = scmp.ge.s32.totalorder %s23_s9, 2  ;;  %p108_p2 = scmp.lt.s32.totalorder %s325_s8, 3 }
   0x5   : > { %s372_s9 = smov (%p25_p1, %s23_s9), 0  ;;  %p109_p3 = pnand %p266_p0, %p108_p2 }
   0x6   : > { %p137_p4 = scmp.lt.s32.totalorder (!%p109_p3), %s317_s6, 1 }
   0x7   : > { %112 = sbr.rel (%p109_p3) target bundleno = 25 (0x19), region = 24 }
   0xc   : > { %s374_s6 = smov (!%p137_p4, %s317_s6), 1  ;;  %v166_v4 = vlaneseq }
   0xd   : > { %s277_s10 = sshll.u32 %s374_s6, 3 }
   0xe   : > { %s144_s13 = scalar_lea.vmem %s367_s0, %s277_s10  ;;  %s154_s16 = scalar_lea.vmem %s368_s1, %s277_s10  ;;  %vm168_vm0 = vcmp.lt.s32.totalorder %v166_v4, 256 }
   0xf   : > { %v156_v0 = vld [vmem:[%s144_s13] ss:$4 sm:$0x3]  ;;  %v271_v1 = vld [vmem:[%s144_s13 + $0x1] ss:$4 sm:$0x3] }
  0x10   : > { %v272_v2 = vld [vmem:[%s144_s13 + $0x2] ss:$4 sm:$0x3]  ;;  %v161_v3 = vmul.f32 0.299, %v156_v0 }
  0x11   : > { %v162_v5 = vmul.f32 0.587, %v271_v1  ;;  %v164_v6 = vmul.f32 0.114, %v272_v2 }
  0x13   : > { %v163_v7 = vadd.f32 %v162_v5, %v161_v3 }
  0x15   : > { %v165_v8 = vadd.f32 %v164_v6, %v163_v7 }
  0x17   : > { %170 = vst.msk [vmem:[%s154_s16] ss:$4 sm:$0x3] %vm168_vm0, %v165_v8  ;;  %273 = vst.msk [vmem:[%s154_s16 + $0x1] ss:$4 sm:$0x3] %vm168_vm0, %v165_v8 }
  0x18   : > { %274 = vst.msk [vmem:[%s154_s16 + $0x2] ss:$4 sm:$0x3] %vm168_vm0, %v165_v8 }
  0x19 PF: > { %s11_s8 = sadd.s32 1, %s325_s8   ;;  %s369_s6 = smov %s321_s7 }
  0x1a   : > { %p8_p5 = scmp.ge.s32.totalorder %s11_s8, 4   ;;  %s370_s7 = smov %s372_s9 }
  0x1c   :  { %10 = sbr.rel (!%p8_p5) target bundleno = 2 (0x2), region = 58 }

</bundles_post_ra>
